<compile_context>
chip_gen: v5e
topology: v5e:2x2
jax: 0.10.0
libtpu: 0.0.40
codegen_flags: <defaults>
</compile_context>

<pallas_src>
import math
from functools import partial

import jax
import jax.numpy as jnp
from jax.experimental import pallas as pl
from jax.experimental.pallas import tpu as pltpu

_LANE = 128     # vreg lane width
_SUBLANE = 8    # f32 sublane count


def _round_up(x, m):
    return (x + m - 1) // m * m


def _cdiv(a, b):
    return -(-a // b)


def _vmem_capacity_bytes():
    """Physical per-core VMEM; conservative 64 MiB (v7x) fallback if the query fails."""
    try:
        cap = getattr(pltpu.get_tpu_info(), "vmem_capacity_bytes", None)
        if cap:
            return int(cap)
    except Exception:
        pass
    return 64 * 1024 * 1024


def _const_block_spec(shape):
    """Grid-invariant block: single-buffered (constant index_map -> nothing to prefetch)."""
    if hasattr(pl, "Buffered"):
        try:
            return pl.BlockSpec(shape, lambda i, k: (0, 0), pipeline_mode=pl.Buffered(1))
        except TypeError:   # very old BlockSpec without pipeline_mode kwarg
            pass
    return pl.BlockSpec(shape, lambda i, k: (0, 0))


def _choose_batch_tiling(B, tm_max):
    nt = max(1, _cdiv(B, tm_max))
    if B > _SUBLANE:
        nt = max(nt, 2)          # >=2 batch tiles so "parallel" shards across v7x's 2 TCs
    tm = _round_up(_cdiv(B, nt), _SUBLANE)
    B_p = nt * tm                # batch padding bounded to < 8 rows per tile
    return tm, nt, B_p


def prepare_mlp_params(params, weight_budget_bytes=None):
    """Pad feature dims to 128 lanes and cast weights to bf16 ONCE (outside the per-call path).

    params: list of (w [din, dout] f32, b [1, dout] f32) in layer order.
    Returns (padded_params, nk) where nk is the number of K tiles the first layer's
    contraction is streamed over (1 = fully resident). Zero padding is exact for Linear+ReLU.
    """
    if weight_budget_bytes is None:
        weight_budget_bytes = _vmem_capacity_bytes() // 4   # ~16 MiB v7x, ~32 MiB v5e/v6e

    dims = [params[0][0].shape[0]] + [w.shape[1] for w, _ in params]
    dims_p = [_round_up(d, _LANE) for d in dims]

    # Stream layer 0's K dim if its resident bf16 weight would blow the VMEM budget.
    In_p, d1_p = dims_p[0], dims_p[1]
    nk, tk = 1, In_p
    if In_p * d1_p * 2 > weight_budget_bytes:
        nk = _cdiv(In_p * d1_p * 2, weight_budget_bytes)
        tk = _round_up(_cdiv(In_p, nk), _LANE)
        nk = _cdiv(In_p, tk)
    dims_p[0] = nk * tk
    # TODO(synk): also N-tile a single extremely wide output layer if it alone exceeds the
    # budget; not needed for typical MLP widths.

    padded = []
    for li, (w, b) in enumerate(params):
        din, dout = w.shape
        din_p, dout_p = dims_p[li], dims_p[li + 1]
        w_p = jnp.zeros((din_p, dout_p), jnp.bfloat16).at[:din, :dout].set(
            w.astype(jnp.bfloat16))
        b_p = jnp.zeros((1, dout_p), jnp.float32).at[:, :dout].set(
            jnp.reshape(b, (1, -1)).astype(jnp.float32))
        padded.append((w_p, b_p))
    return tuple(padded), nk


def _make_fused_mlp_kernel(n_layers):
    """Fused [Linear(+ReLU)]*n_layers; layer-0 contraction streamed over grid axis 1."""

    def kernel(*refs):
        # refs = x, (w0, b0), ..., (w_{n-1}, b_{n-1}), o, acc
        x_ref = refs[0]
        w_refs = refs[1:1 + 2 * n_layers:2]
        b_refs = refs[2:1 + 2 * n_layers:2]
        o_ref = refs[1 + 2 * n_layers]
        acc_ref = refs[2 + 2 * n_layers]

        k = pl.program_id(1)

        @pl.when(k == 0)
        def _():
            acc_ref[...] = jnp.zeros_like(acc_ref)

        # Layer 0: bf16 x bf16 -> f32 accumulate on the MXU, one K tile per grid step.
        acc_ref[...] += jnp.dot(x_ref[...], w_refs[0][...],
                                preferred_element_type=jnp.float32)

        @pl.when(k == pl.num_programs(1) - 1)
        def _():
            h = acc_ref[...] + b_refs[0][...]             # bias in f32
            for li in range(1, n_layers):
                h = jnp.maximum(h, 0.0).astype(jnp.bfloat16)   # ReLU (VPU) -> bf16 MXU input
                h = jnp.dot(h, w_refs[li][...],
                            preferred_element_type=jnp.float32) + b_refs[li][...]
            o_ref[...] = h.astype(o_ref.dtype)            # last layer: no ReLU

    return kernel


def fused_mlp_pallas(x2d, padded_params, *, nk=1, out_dim=None, out_dtype=jnp.float32):
    """x2d: [B, In]. padded_params/nk: output of prepare_mlp_params. Returns [B, out_dim]."""
    B, In = x2d.shape
    n_layers = len(padded_params)
    dims_p = [padded_params[0][0].shape[0]] + [w.shape[1] for w, _ in padded_params]
    In_pp, d1_p, out_p = dims_p[0], dims_p[1], dims_p[-1]
    assert In <= In_pp and In_pp % nk == 0
    tk = In_pp // nk
    if out_dim is None:
        out_dim = out_p
    out_itemsize = jnp.dtype(out_dtype).itemsize

    vmem_cap = _vmem_capacity_bytes()
    tm_max = 512 if vmem_cap >= (96 << 20) else 256   # v5e/v6e: 128 MiB VMEM; v7x: 64 MiB
    tm, nt, B_p = _choose_batch_tiling(B, tm_max)

    # Per-call activation padding only; weights were padded/cast once in prepare_mlp_params.
    x_p = jnp.pad(x2d.astype(jnp.bfloat16), ((0, B_p - B), (0, In_pp - In)))

    flat_inputs = [x_p]
    in_specs = [pl.BlockSpec((tm, tk), lambda i, k: (i, k))]

    w0, b0 = padded_params[0]
    flat_inputs += [w0, b0]
    if nk > 1:
        in_specs.append(pl.BlockSpec((tk, d1_p), lambda i, k: (k, 0)))  # streamed, double-buffered
    else:
        in_specs.append(_const_block_spec((tk, d1_p)))                   # resident, single-buffered
    in_specs.append(_const_block_spec((1, d1_p)))
    for li in range(1, n_layers):
        w_p, b_p = padded_params[li]
        flat_inputs += [w_p, b_p]
        in_specs.append(_const_block_spec(w_p.shape))
        in_specs.append(_const_block_spec((1, w_p.shape[1])))

    # Cost estimate (advisory for XLA scheduling).
    flops = 0
    bytes_accessed = x_p.size * 2
    for w_p, b_p in padded_params:
        flops += 2 * B_p * w_p.shape[0] * w_p.shape[1]
        bytes_accessed += w_p.size * 2 + b_p.size * 4
    bytes_accessed += B_p * out_p * out_itemsize

    # Explicit scoped-VMEM limit from the real resident footprint (+headroom).
    resident = tm * tk * 2 * 2                                   # x tile, double-buffered
    resident += tk * d1_p * 2 * (2 if nk > 1 else 1)             # layer-0 weight
    resident += d1_p * 4                                         # layer-0 bias
    for w_p, b_p in padded_params[1:]:
        resident += w_p.size * 2 + b_p.size * 4                  # resident, single-buffered
    resident += tm * d1_p * 4                                    # f32 accumulator scratch
    resident += tm * out_p * out_itemsize * 2                    # out tile, double-buffered
    resident += tm * max(dims_p[1:]) * 4 * 2                     # live activation values
    vmem_limit = int(min(max(int(resident * 1.3) + (2 << 20), 32 << 20),
                         vmem_cap * 3 // 4))

    out_padded = pl.pallas_call(
        _make_fused_mlp_kernel(n_layers),
        out_shape=jax.ShapeDtypeStruct((B_p, out_p), out_dtype),
        grid=(nt, nk),
        in_specs=in_specs,
        out_specs=pl.BlockSpec((tm, out_p), lambda i, k: (i, 0)),
        scratch_shapes=[pltpu.VMEM((tm, d1_p), jnp.float32)],
        compiler_params=pltpu.CompilerParams(
            dimension_semantics=("parallel", "arbitrary"),
            vmem_limit_bytes=vmem_limit,
        ),
        cost_estimate=pl.CostEstimate(
            flops=flops, transcendentals=0, bytes_accessed=bytes_accessed),
    )(*flat_inputs)

    return out_padded[:B, :out_dim]


def init_mlp_params(key, input_dim, hiddens, output_dim, dtype=jnp.float32):
    """Deterministic init mimicking PyTorch nn.Linear default: U(-1/sqrt(fan_in), 1/sqrt(fan_in))."""
    dims = [input_dim] + list(hiddens) + [output_dim]
    params = []
    for i in range(len(dims) - 1):
        fan_in, fan_out = dims[i], dims[i + 1]
        key, kw, kb = jax.random.split(key, 3)
        bound = 1.0 / math.sqrt(fan_in)
        w = jax.random.uniform(kw, (fan_in, fan_out), dtype, -bound, bound)
        b = jax.random.uniform(kb, (1, fan_out), dtype, -bound, bound)
        params.append((w, b))
    return params


@partial(jax.jit, static_argnames=("output_dim", "nk"))
def fully_connected_mlp_forward(x, padded_params, output_dim, nk=1):
    """FullyConnectedMLP.forward: x.view(B, -1) -> fused MLP -> view(B, output_dim)."""
    batch_size = x.shape[0]
    h = x.reshape(batch_size, -1)
    # out_dtype=jnp.bfloat16 halves the output writeback if the consumer tolerates it.
    out = fused_mlp_pallas(h, padded_params, nk=nk, out_dim=output_dim,
                           out_dtype=jnp.float32)
    return out.reshape(batch_size, output_dim)


if __name__ == "__main__":
    key = jax.random.PRNGKey(0)
    kx, kp = jax.random.split(key)

    # Small, module-consistent shapes.
    batch, C, H, W = 2, 4, 16, 16
    input_dim = C * H * W          # 1024 after flatten
    hiddens = [32, 32]
    output_dim = 8

    x = jax.random.normal(kx, (batch, C, H, W), dtype=jnp.float32)
    params = init_mlp_params(kp, input_dim, hiddens, output_dim)

    # One-time weight padding / bf16 cast (hoisted out of the per-call path).
    padded_params, nk = prepare_mlp_params(params)

    out = fully_connected_mlp_forward(x, padded_params, output_dim, nk=nk)
    out = jax.block_until_ready(out)
    assert out.shape == (batch, output_dim)

    # Reference 1: same bf16-in / f32-accumulate matmul policy as the kernel (tight check).
    h = x.reshape(batch, -1)
    for li, (w, b) in enumerate(params):
        h = jnp.dot(h.astype(jnp.bfloat16), w.astype(jnp.bfloat16),
                    preferred_element_type=jnp.float32) + b
        if li != len(params) - 1:
            h = jnp.maximum(h, 0.0)
    ref_bf16 = h.reshape(batch, output_dim)
    assert jnp.allclose(out, ref_bf16, atol=1e-3, rtol=1e-3)

    # Reference 2: full-f32 math (loose check -- bounds the bf16 quantization error).
    h = x.reshape(batch, -1)
    for li, (w, b) in enumerate(params):
        h = h @ w + b
        if li != len(params) - 1:
            h = jnp.maximum(h, 0.0)
    ref_f32 = h.reshape(batch, output_dim)
    assert jnp.allclose(out, ref_f32, atol=5e-2, rtol=5e-2)

    print("KERNEL_OK")
</pallas_src>

<mosaic_0001>
module attributes {stable_mosaic.version = 11 : i64} {
  func.func @kernel(%arg0: i32, %arg1: i32, %arg2: memref<8x1024xbf16, #tpu.memory_space<vmem>>, %arg3: memref<1024x128xbf16, #tpu.memory_space<vmem>>, %arg4: memref<1x128xf32, #tpu.memory_space<vmem>>, %arg5: memref<128x128xbf16, #tpu.memory_space<vmem>>, %arg6: memref<1x128xf32, #tpu.memory_space<vmem>>, %arg7: memref<128x128xbf16, #tpu.memory_space<vmem>>, %arg8: memref<1x128xf32, #tpu.memory_space<vmem>>, %arg9: memref<8x128xf32, #tpu.memory_space<vmem>>, %arg10: memref<8x128xf32, #tpu.memory_space<vmem>>) attributes {dimension_semantics = [#tpu.dimension_semantics<parallel>, #tpu.dimension_semantics<arbitrary>], iteration_bounds = array<i64: 1, 1>, scalar_prefetch = 0 : i64, scratch_operands = 1 : i64, tpu.core_type = #tpu.core_type<tc>, window_params = [{transform_indices = @transform_0, window_bounds = array<i64: 8, 1024>}, {pipeline_mode = #tpu.pipeline_mode<synchronous>, transform_indices = @transform_1, window_bounds = array<i64: 1024, 128>}, {pipeline_mode = #tpu.pipeline_mode<synchronous>, transform_indices = @transform_2, window_bounds = array<i64: 1, 128>}, {pipeline_mode = #tpu.pipeline_mode<synchronous>, transform_indices = @transform_3, window_bounds = array<i64: 128, 128>}, {pipeline_mode = #tpu.pipeline_mode<synchronous>, transform_indices = @transform_4, window_bounds = array<i64: 1, 128>}, {pipeline_mode = #tpu.pipeline_mode<synchronous>, transform_indices = @transform_5, window_bounds = array<i64: 128, 128>}, {pipeline_mode = #tpu.pipeline_mode<synchronous>, transform_indices = @transform_6, window_bounds = array<i64: 1, 128>}, {transform_indices = @transform_7, window_bounds = array<i64: 8, 128>}]} {
    %c0_i32 = arith.constant 0 : i32
    %0 = arith.cmpi eq, %arg1, %c0_i32 : i32
    %1 = arith.extui %0 : i1 to i32
    %c0_i32_0 = arith.constant 0 : i32
    %2 = arith.cmpi ne, %1, %c0_i32_0 : i32
    scf.if %2 {
      %cst_10 = arith.constant 0.000000e+00 : f32
      %12 = vector.broadcast %cst_10 : f32 to vector<8x128xf32>
      %c0_11 = arith.constant 0 : index
      %c0_12 = arith.constant 0 : index
      %13 = vector.load %arg10[%c0_11, %c0_12] : memref<8x128xf32, #tpu.memory_space<vmem>>, vector<8x128xf32>
      tpu.vector_store %arg10[%c0_11, %c0_12], %12 {strides = array<i32>} : memref<8x128xf32, #tpu.memory_space<vmem>>, vector<8x128xf32>,
    } else {
    }
    %c0 = arith.constant 0 : index
    %c0_1 = arith.constant 0 : index
    %3 = vector.load %arg10[%c0, %c0_1] : memref<8x128xf32, #tpu.memory_space<vmem>>, vector<8x128xf32>
    %c0_2 = arith.constant 0 : index
    %c0_3 = arith.constant 0 : index
    %4 = vector.load %arg2[%c0_2, %c0_3] : memref<8x1024xbf16, #tpu.memory_space<vmem>>, vector<8x1024xbf16>
    %c0_4 = arith.constant 0 : index
    %c0_5 = arith.constant 0 : index
    %5 = vector.load %arg3[%c0_4, %c0_5] : memref<1024x128xbf16, #tpu.memory_space<vmem>>, vector<1024x128xbf16>
    %cst = arith.constant dense<0.000000e+00> : vector<8x128xf32>
    %6 = tpu.matmul %4, %5, %cst {dimension_numbers = #tpu.dot_dimension_numbers<[1], [0], [0], [1], [0, 0, 1, 1], [], []>} : vector<8x1024xbf16>, vector<1024x128xbf16>, vector<8x128xf32> -> vector<8x128xf32>
    %7 = arith.addf %3, %6 : vector<8x128xf32>
    %c0_6 = arith.constant 0 : index
    %c0_7 = arith.constant 0 : index
    %8 = vector.load %arg10[%c0_6, %c0_7] : memref<8x128xf32, #tpu.memory_space<vmem>>, vector<8x128xf32>
    tpu.vector_store %arg10[%c0_6, %c0_7], %7 {strides = array<i32>} : memref<8x128xf32, #tpu.memory_space<vmem>>, vector<8x128xf32>,
    %c0_i32_8 = arith.constant 0 : i32
    %9 = arith.cmpi eq, %arg1, %c0_i32_8 : i32
    %10 = arith.extui %9 : i1 to i32
    %c0_i32_9 = arith.constant 0 : i32
    %11 = arith.cmpi ne, %10, %c0_i32_9 : i32
    scf.if %11 {
      %c0_10 = arith.constant 0 : index
      %c0_11 = arith.constant 0 : index
      %12 = vector.load %arg10[%c0_10, %c0_11] : memref<8x128xf32, #tpu.memory_space<vmem>>, vector<8x128xf32>
      %c0_12 = arith.constant 0 : index
      %c0_13 = arith.constant 0 : index
      %13 = vector.load %arg4[%c0_12, %c0_13] : memref<1x128xf32, #tpu.memory_space<vmem>>, vector<1x128xf32>
      %14 = vector.broadcast %13 : vector<1x128xf32> to vector<8x128xf32>
      %15 = arith.addf %12, %14 : vector<8x128xf32>
      %cst_14 = arith.constant 0.000000e+00 : f32
      %16 = vector.broadcast %cst_14 : f32 to vector<8x128xf32>
      %17 = arith.maximumf %15, %16 : vector<8x128xf32>
      %18 = arith.truncf %17 : vector<8x128xf32> to vector<8x128xbf16>
      %c0_15 = arith.constant 0 : index
      %c0_16 = arith.constant 0 : index
      %19 = vector.load %arg5[%c0_15, %c0_16] : memref<128x128xbf16, #tpu.memory_space<vmem>>, vector<128x128xbf16>
      %cst_17 = arith.constant dense<0.000000e+00> : vector<8x128xf32>
      %20 = tpu.matmul %18, %19, %cst_17 {dimension_numbers = #tpu.dot_dimension_numbers<[1], [0], [0], [1], [0, 0, 1, 1], [], []>} : vector<8x128xbf16>, vector<128x128xbf16>, vector<8x128xf32> -> vector<8x128xf32>
      %c0_18 = arith.constant 0 : index
      %c0_19 = arith.constant 0 : index
      %21 = vector.load %arg6[%c0_18, %c0_19] : memref<1x128xf32, #tpu.memory_space<vmem>>, vector<1x128xf32>
      %22 = vector.broadcast %21 : vector<1x128xf32> to vector<8x128xf32>
      %23 = arith.addf %20, %22 : vector<8x128xf32>
      %cst_20 = arith.constant 0.000000e+00 : f32
      %24 = vector.broadcast %cst_20 : f32 to vector<8x128xf32>
      %25 = arith.maximumf %23, %24 : vector<8x128xf32>
      %26 = arith.truncf %25 : vector<8x128xf32> to vector<8x128xbf16>
      %c0_21 = arith.constant 0 : index
      %c0_22 = arith.constant 0 : index
      %27 = vector.load %arg7[%c0_21, %c0_22] : memref<128x128xbf16, #tpu.memory_space<vmem>>, vector<128x128xbf16>
      %cst_23 = arith.constant dense<0.000000e+00> : vector<8x128xf32>
      %28 = tpu.matmul %26, %27, %cst_23 {dimension_numbers = #tpu.dot_dimension_numbers<[1], [0], [0], [1], [0, 0, 1, 1], [], []>} : vector<8x128xbf16>, vector<128x128xbf16>, vector<8x128xf32> -> vector<8x128xf32>
      %c0_24 = arith.constant 0 : index
      %c0_25 = arith.constant 0 : index
      %29 = vector.load %arg8[%c0_24, %c0_25] : memref<1x128xf32, #tpu.memory_space<vmem>>, vector<1x128xf32>
      %30 = vector.broadcast %29 : vector<1x128xf32> to vector<8x128xf32>
      %31 = arith.addf %28, %30 : vector<8x128xf32>
      %c0_26 = arith.constant 0 : index
      %c0_27 = arith.constant 0 : index
      %32 = vector.load %arg9[%c0_26, %c0_27] : memref<8x128xf32, #tpu.memory_space<vmem>>, vector<8x128xf32>
      tpu.vector_store %arg9[%c0_26, %c0_27], %31 {strides = array<i32>} : memref<8x128xf32, #tpu.memory_space<vmem>>, vector<8x128xf32>,
    } else {
    }
    return
  }
  func.func @transform_0(%arg0: i32, %arg1: i32) -> (i32, i32) {
    %c0_i32 = arith.constant 0 : i32
    return %arg0, %arg1 : i32, i32
  }
  func.func @transform_1(%arg0: i32, %arg1: i32) -> (i32, i32) {
    %c0_i32 = arith.constant 0 : i32
    %c0_i32_0 = arith.constant 0 : i32
    %c0_i32_1 = arith.constant 0 : i32
    return %c0_i32, %c0_i32_0 : i32, i32
  }
  func.func @transform_2(%arg0: i32, %arg1: i32) -> (i32, i32) {
    %c0_i32 = arith.constant 0 : i32
    %c0_i32_0 = arith.constant 0 : i32
    %c0_i32_1 = arith.constant 0 : i32
    return %c0_i32, %c0_i32_0 : i32, i32
  }
  func.func @transform_3(%arg0: i32, %arg1: i32) -> (i32, i32) {
    %c0_i32 = arith.constant 0 : i32
    %c0_i32_0 = arith.constant 0 : i32
    %c0_i32_1 = arith.constant 0 : i32
    return %c0_i32, %c0_i32_0 : i32, i32
  }
  func.func @transform_4(%arg0: i32, %arg1: i32) -> (i32, i32) {
    %c0_i32 = arith.constant 0 : i32
    %c0_i32_0 = arith.constant 0 : i32
    %c0_i32_1 = arith.constant 0 : i32
    return %c0_i32, %c0_i32_0 : i32, i32
  }
  func.func @transform_5(%arg0: i32, %arg1: i32) -> (i32, i32) {
    %c0_i32 = arith.constant 0 : i32
    %c0_i32_0 = arith.constant 0 : i32
    %c0_i32_1 = arith.constant 0 : i32
    return %c0_i32, %c0_i32_0 : i32, i32
  }
  func.func @transform_6(%arg0: i32, %arg1: i32) -> (i32, i32) {
    %c0_i32 = arith.constant 0 : i32
    %c0_i32_0 = arith.constant 0 : i32
    %c0_i32_1 = arith.constant 0 : i32
    return %c0_i32, %c0_i32_0 : i32, i32
  }
  func.func @transform_7(%arg0: i32, %arg1: i32) -> (i32, i32) {
    %c0_i32 = arith.constant 0 : i32
    %c0_i32_0 = arith.constant 0 : i32
    return %arg0, %c0_i32 : i32, i32
  }
}

</mosaic_0001>

<bundles_post_ra>
// kernel: fully_connected_mlp_forward.1
= control target key start
LH: loop header
LB: loop body
LE: loop exit
PB: predicated region body
PF: predicated region fallthrough
CT: control target
= control target key end

     0   :  { %12 = vsyncpa [#allocation4], 0  ;;  %s1311_s27 = smov [#allocation3]   ;;  %s1312_s29 = smov 64   ;;  %s1429_s0 = inlined_call_operand.vmem [shape: bf16[8,1024], index: 0, kind: input, shape index: {}]   ;;  %s1430_s1 = inlined_call_operand.hbm [shape: bf16[1024,128], index: 1, kind: input, shape index: {}]   ;;  %s1431_s2 = inlined_call_operand.vmem [shape: f32[1,128], index: 2, kind: input, shape index: {}]   ;;  %s1432_s3 = inlined_call_operand.vmem [shape: bf16[128,128], index: 3, kind: input, shape index: {}]   ;;  %s1433_s4 = inlined_call_operand.vmem [shape: f32[1,128], index: 4, kind: input, shape index: {}]   ;;  %s1434_s5 = inlined_call_operand.vmem [shape: bf16[128,128], index: 5, kind: input, shape index: {}]   ;;  %s1435_s6 = inlined_call_operand.vmem [shape: f32[1,128], index: 6, kind: input, shape index: {}]   ;;  %s1436_s7 = inlined_call_operand.vmem [shape: f32[8,128], index: 7, kind: output, shape index: {}]  }
   0x1   :  { %s19_s26 = sshll.u32 %s1430_s1, 4  ;;  %s21_s28 = sshll.u32 %s1311_s27, 4  ;;  %s20_s26 = int_to_ptr.hbm [resolvable:$true] %s19_s26  ;;  %s22_s28 = int_to_ptr.vmem [resolvable:$true] %s21_s28 }
   0x2   :  { %s1313_s30 = smov 4  }
   0x3   :  { %27 = dma.hbm_to_vmem [thread:$0]  %s20_s26, 8192, %s22_s28, [#allocation4], %s1312_s29, %s1312_s29, %s1313_s30  }
   0x4   :  { %1309 = dma.done.wait [#allocation4], 8192  }
   0x5   :  { %1310 = vsyncadd [#allocation4], 4294959104  ;;  %v1206_v0 = vld [vmem:[#allocation3 + $0x38] sm:$0xff]  ;;  %v1205_v4 = vld [vmem:[#allocation3 + $0x30] sm:$0xff] }
   0x6   :  { %v1214_v1 = vld [vmem:[#allocation3 + $0x78] sm:$0xff]  ;;  %592 = vmatpush.bf16.msra.mxu0 %v1206_v0  ;;  %v1213_v5 = vld [vmem:[#allocation3 + $0x70] sm:$0xff]  ;;  %v1204_v8 = vld [vmem:[#allocation3 + $0x28] sm:$0xff] }
   0x7   :  { %v1222_v2 = vld [vmem:[#allocation3 + $0xb8] sm:$0xff]  ;;  %605 = vmatpush.bf16.msra.mxu1 %v1214_v1  ;;  %v1221_v6 = vld [vmem:[#allocation3 + $0xb0] sm:$0xff]  ;;  %v1212_v9 = vld [vmem:[#allocation3 + $0x68] sm:$0xff] }
   0x8   :  { %v1230_v3 = vld [vmem:[#allocation3 + $0xf8] sm:$0xff]  ;;  %618 = vmatpush.bf16.msra.mxu2 %v1222_v2  ;;  %v1229_v7 = vld [vmem:[#allocation3 + $0xf0] sm:$0xff]  ;;  %v1220_v10 = vld [vmem:[#allocation3 + $0xa8] sm:$0xff] }
   0x9   :  { %631 = vmatpush.bf16.msra.mxu3 %v1230_v3  ;;  %v1228_v11 = vld [vmem:[#allocation3 + $0xe8] sm:$0xff]  ;;  %v1203_v12 = vld [vmem:[#allocation3 + $0x20] sm:$0xff]  ;;  %v1202_v16 = vld [vmem:[#allocation3 + $0x18] sm:$0xff] }
   0xa   :  { %593 = vmatpush.bf16.msra.mxu0 %v1205_v4  ;;  %v1211_v13 = vld [vmem:[#allocation3 + $0x60] sm:$0xff]  ;;  %v1210_v17 = vld [vmem:[#allocation3 + $0x58] sm:$0xff]  ;;  %v1201_v20 = vld [vmem:[#allocation3 + $0x10] sm:$0xff] }
   0xb   :  { %606 = vmatpush.bf16.msra.mxu1 %v1213_v5  ;;  %v1219_v14 = vld [vmem:[#allocation3 + $0xa0] sm:$0xff]  ;;  %v1218_v18 = vld [vmem:[#allocation3 + $0x98] sm:$0xff]  ;;  %v1209_v21 = vld [vmem:[#allocation3 + $0x50] sm:$0xff] }
   0xc   :  { %619 = vmatpush.bf16.msra.mxu2 %v1221_v6  ;;  %v1227_v15 = vld [vmem:[#allocation3 + $0xe0] sm:$0xff]  ;;  %v1226_v19 = vld [vmem:[#allocation3 + $0xd8] sm:$0xff]  ;;  %v1217_v22 = vld [vmem:[#allocation3 + $0x90] sm:$0xff] }
   0xd   :  { %632 = vmatpush.bf16.msra.mxu3 %v1229_v7  ;;  %v1225_v23 = vld [vmem:[#allocation3 + $0xd0] sm:$0xff]  ;;  %v1200_v24 = vld [vmem:[#allocation3 + $0x8] sm:$0xff]  ;;  %v48_v29 = vld [vmem:[%s1429_s0] sm:$0xff] }
   0xe   :  { %594 = vmatpush.bf16.msra.mxu0 %v1204_v8  ;;  %v1208_v25 = vld [vmem:[#allocation3 + $0x48] sm:$0xff]  ;;  %v1199_v30 = vld [vmem:[#allocation3] sm:$0xff]  ;;  %v184_v33 = vunpack.c.l.b16 %v48_v29  ;;  %v185_v37 = vunpack.c.h.b16 %v48_v29  ;;  %v1238_v38 = vld [vmem:[#allocation3 + $0x138] sm:$0xff] }
   0xf   :  { %607 = vmatpush.bf16.msra.mxu1 %v1212_v9  ;;  %v1216_v26 = vld [vmem:[#allocation3 + $0x88] sm:$0xff]  ;;  %v1207_v31 = vld [vmem:[#allocation3 + $0x40] sm:$0xff]  ;;  %v1246_v39 = vld [vmem:[#allocation3 + $0x178] sm:$0xff] }
  0x10   :  { %620 = vmatpush.bf16.msra.mxu2 %v1220_v10  ;;  %v1224_v27 = vld [vmem:[#allocation3 + $0xc8] sm:$0xff]  ;;  %v1215_v34 = vld [vmem:[#allocation3 + $0x80] sm:$0xff]  ;;  %v1254_v40 = vld [vmem:[#allocation3 + $0x1b8] sm:$0xff]  ;;  %v192_v43 = vpack.c.b16 %v184_v33, %v184_v33  ;;  %v193_v45 = vpack.c.b16 %v185_v37, %v185_v37 }
  0x11   :  { %633 = vmatpush.bf16.msra.mxu3 %v1228_v11  ;;  %v49_v28 = vld [vmem:[%s1429_s0 + $0x8] sm:$0xff]  ;;  %v1223_v35 = vld [vmem:[#allocation3 + $0xc0] sm:$0xff]  ;;  %v1262_v41 = vld [vmem:[#allocation3 + $0x1f8] sm:$0xff] }
  0x12   :  { %595 = vmatpush.bf16.msra.mxu0 %v1203_v12  ;;  %v186_v32 = vunpack.c.l.b16 %v49_v28  ;;  %v187_v36 = vunpack.c.h.b16 %v49_v28  ;;  %v1237_v46 = vld [vmem:[#allocation3 + $0x130] sm:$0xff]  ;;  %v1236_v50 = vld [vmem:[#allocation3 + $0x128] sm:$0xff]  ;;  %v1235_v54 = vld [vmem:[#allocation3 + $0x120] sm:$0xff] }
  0x13   :  { %608 = vmatpush.bf16.msra.mxu1 %v1211_v13  ;;  %v1245_v47 = vld [vmem:[#allocation3 + $0x170] sm:$0xff]  ;;  %v1244_v51 = vld [vmem:[#allocation3 + $0x168] sm:$0xff]  ;;  %v1243_v55 = vld [vmem:[#allocation3 + $0x160] sm:$0xff] }
  0x14   :  { %621 = vmatpush.bf16.msra.mxu2 %v1219_v14  ;;  %v194_v42 = vpack.c.b16 %v186_v32, %v186_v32  ;;  %v195_v44 = vpack.c.b16 %v187_v36, %v187_v36  ;;  %v1253_v48 = vld [vmem:[#allocation3 + $0x1b0] sm:$0xff]  ;;  %v1252_v52 = vld [vmem:[#allocation3 + $0x1a8] sm:$0xff]  ;;  %v1251_v56 = vld [vmem:[#allocation3 + $0x1a0] sm:$0xff] }
  0x15   :  { %634 = vmatpush.bf16.msra.mxu3 %v1227_v15  ;;  %v1261_v49 = vld [vmem:[#allocation3 + $0x1f0] sm:$0xff]  ;;  %v1260_v53 = vld [vmem:[#allocation3 + $0x1e8] sm:$0xff]  ;;  %v1259_v57 = vld [vmem:[#allocation3 + $0x1e0] sm:$0xff] }
  0x16   :  { %596 = vmatpush.bf16.msra.mxu0 %v1202_v16  ;;  %v1234_v58 = vld [vmem:[#allocation3 + $0x118] sm:$0xff]  ;;  %v1233_v62 = vld [vmem:[#allocation3 + $0x110] sm:$0xff]  ;;  %v1232_v2 = vld [vmem:[#allocation3 + $0x108] sm:$0xff] }
  0x17   :  { %609 = vmatpush.bf16.msra.mxu1 %v1210_v17  ;;  %v1242_v59 = vld [vmem:[#allocation3 + $0x158] sm:$0xff]  ;;  %v1241_v63 = vld [vmem:[#allocation3 + $0x150] sm:$0xff]  ;;  %v1240_v3 = vld [vmem:[#allocation3 + $0x148] sm:$0xff] }
  0x18   :  { %622 = vmatpush.bf16.msra.mxu2 %v1218_v18  ;;  %v1250_v60 = vld [vmem:[#allocation3 + $0x198] sm:$0xff]  ;;  %v1249_v0 = vld [vmem:[#allocation3 + $0x190] sm:$0xff]  ;;  %v1248_v5 = vld [vmem:[#allocation3 + $0x188] sm:$0xff] }
  0x19   :  { %635 = vmatpush.bf16.msra.mxu3 %v1226_v19  ;;  %v1258_v61 = vld [vmem:[#allocation3 + $0x1d8] sm:$0xff]  ;;  %v1257_v1 = vld [vmem:[#allocation3 + $0x1d0] sm:$0xff]  ;;  %v1256_v6 = vld [vmem:[#allocation3 + $0x1c8] sm:$0xff] }
  0x1a   :  { %597 = vmatpush.bf16.msra.mxu0 %v1201_v20  ;;  %v50_v4 = vld [vmem:[%s1429_s0 + $0x10] sm:$0xff]  ;;  %v51_v7 = vld [vmem:[%s1429_s0 + $0x18] sm:$0xff]  ;;  %v1231_v10 = vld [vmem:[#allocation3 + $0x100] sm:$0xff] }
  0x1b   :  { %610 = vmatpush.bf16.msra.mxu1 %v1209_v21  ;;  %v188_v8 = vunpack.c.l.b16 %v50_v4  ;;  %v189_v9 = vunpack.c.h.b16 %v50_v4  ;;  %v1239_v11 = vld [vmem:[#allocation3 + $0x140] sm:$0xff]  ;;  %v190_v12 = vunpack.c.l.b16 %v51_v7  ;;  %v191_v13 = vunpack.c.h.b16 %v51_v7  ;;  %v1270_v20 = vld [vmem:[%s1432_s3 + $0x38] sm:$0xff]  ;;  %v1269_v21 = vld [vmem:[%s1432_s3 + $0x30] sm:$0xff] }
  0x1c   :  { %623 = vmatpush.bf16.msra.mxu2 %v1217_v22  ;;  %v1247_v14 = vld [vmem:[#allocation3 + $0x180] sm:$0xff]  ;;  %v1268_v22 = vld [vmem:[%s1432_s3 + $0x28] sm:$0xff]  ;;  %v1278_v36 = vld [vmem:[%s1434_s5 + $0x38] sm:$0xff] }
  0x1d   :  { %636 = vmatpush.bf16.msra.mxu3 %v1225_v23  ;;  %v1255_v15 = vld [vmem:[#allocation3 + $0x1c0] sm:$0xff]  ;;  %v196_v16 = vpack.c.b16 %v188_v8, %v188_v8  ;;  %v197_v17 = vpack.c.b16 %v189_v9, %v189_v9  ;;  %v198_v18 = vpack.c.b16 %v190_v12, %v190_v12  ;;  %v199_v19 = vpack.c.b16 %v191_v13, %v191_v13  ;;  %v1264_v29 = vld [vmem:[%s1432_s3 + $0x8] sm:$0xff]  ;;  %v1277_v37 = vld [vmem:[%s1434_s5 + $0x30] sm:$0xff] }
  0x1e   :  { %598 = vmatpush.bf16.msra.mxu0 %v1200_v24  ;;  %v1267_v23 = vld [vmem:[%s1432_s3 + $0x20] sm:$0xff]  ;;  %v1266_v24 = vld [vmem:[%s1432_s3 + $0x18] sm:$0xff] }
  0x1f   :  { %611 = vmatpush.bf16.msra.mxu1 %v1208_v25  ;;  %v1263_v33 = vld [vmem:[%s1432_s3] sm:$0xff] }
  0x20   :  { %624 = vmatpush.bf16.msra.mxu2 %v1216_v26 }
  0x21   :  { %637 = vmatpush.bf16.msra.mxu3 %v1224_v27  ;;  %v1265_v27 = vld [vmem:[%s1432_s3 + $0x10] sm:$0xff] }
  0x22   :  { %599 = vmatpush.bf16.msra.mxu0 %v1199_v30 }
  0x23   :  { %612 = vmatpush.bf16.msra.mxu1 %v1207_v31 }
  0x24   :  { %625 = vmatpush.bf16.msra.mxu2 %v1215_v34 }
  0x25   :  { %638 = vmatpush.bf16.msra.mxu3 %v1223_v35  ;;  %600 = vmatmul.bf16.vlgmr.msra.gmra.mxu0 %v192_v43 }
  0x26   :  { %644 = vmatpush.bf16.msrb.mxu0 %v1238_v38  ;;  %613 = vmatmul.bf16.vlgmr.msra.gmra.mxu1 %v193_v45  ;;  %v1274_v45 = vld [vmem:[%s1434_s5 + $0x18] sm:$0xff] }
  0x27   :  { %657 = vmatpush.bf16.msrb.mxu1 %v1246_v39  ;;  %626 = vmatmul.bf16.vlgmr.msra.gmra.mxu2 %v194_v42  ;;  %v1276_v39 = vld [vmem:[%s1434_s5 + $0x28] sm:$0xff] }
  0x28   :  { %670 = vmatpush.bf16.msrb.mxu2 %v1254_v40  ;;  %639 = vmatmul.bf16.vlgmr.msra.gmra.mxu3 %v195_v44 }
  0x29   :  { %683 = vmatpush.bf16.msrb.mxu3 %v1262_v41  ;;  %v1275_v41 = vld [vmem:[%s1434_s5 + $0x20] sm:$0xff] }
  0x2a   :  { %645 = vmatpush.bf16.msrb.mxu0 %v1237_v46 }
  0x2b   :  { %658 = vmatpush.bf16.msrb.mxu1 %v1245_v47  ;;  %v1273_v47 = vld [vmem:[%s1434_s5 + $0x10] sm:$0xff] }
  0x2c   :  { %671 = vmatpush.bf16.msrb.mxu2 %v1253_v48 }
  0x2d   :  { %684 = vmatpush.bf16.msrb.mxu3 %v1261_v49 }
  0x2e   :  { %646 = vmatpush.bf16.msrb.mxu0 %v1236_v50 }
  0x2f   :  { %659 = vmatpush.bf16.msrb.mxu1 %v1244_v51 }
  0x30   :  { %672 = vmatpush.bf16.msrb.mxu2 %v1252_v52  ;;  %v1282_v52 = vld [vmem:[%s1431_s2] ss:$0 sm:$0xff] }
  0x31   :  { %685 = vmatpush.bf16.msrb.mxu3 %v1260_v53 }
  0x32   :  { %647 = vmatpush.bf16.msrb.mxu0 %v1235_v54 }
  0x33   :  { %660 = vmatpush.bf16.msrb.mxu1 %v1243_v55 }
  0x34   :  { %673 = vmatpush.bf16.msrb.mxu2 %v1251_v56 }
  0x35   :  { %686 = vmatpush.bf16.msrb.mxu3 %v1259_v57 }
  0x36   :  { %648 = vmatpush.bf16.msrb.mxu0 %v1234_v58 }
  0x37   :  { %661 = vmatpush.bf16.msrb.mxu1 %v1242_v59 }
  0x38   :  { %674 = vmatpush.bf16.msrb.mxu2 %v1250_v60 }
  0x39   :  { %687 = vmatpush.bf16.msrb.mxu3 %v1258_v61  ;;  %v1272_v61 = vld [vmem:[%s1434_s5 + $0x8] sm:$0xff] }
  0x3a   :  { %649 = vmatpush.bf16.msrb.mxu0 %v1233_v62  ;;  %v1271_v62 = vld [vmem:[%s1434_s5] sm:$0xff] }
  0x3b   :  { %662 = vmatpush.bf16.msrb.mxu1 %v1241_v63  ;;  %v1283_v63 = vld [vmem:[%s1433_s4] ss:$0 sm:$0xff] }
  0x3c   :  { %675 = vmatpush.bf16.msrb.mxu2 %v1249_v0 }
  0x3d   :  { %688 = vmatpush.bf16.msrb.mxu3 %v1257_v1 }
  0x3e   :  { %650 = vmatpush.bf16.msrb.mxu0 %v1232_v2 }
  0x3f   :  { %663 = vmatpush.bf16.msrb.mxu1 %v1240_v3 }
  0x40   :  { %676 = vmatpush.bf16.msrb.mxu2 %v1248_v5  ;;  %v1284_v5 = vld [vmem:[%s1435_s6] ss:$0 sm:$0xff] }
  0x41   :  { %689 = vmatpush.bf16.msrb.mxu3 %v1256_v6 }
  0x42   :  { %651 = vmatpush.bf16.msrb.mxu0 %v1231_v10 }
  0x43   :  { %664 = vmatpush.bf16.msrb.mxu1 %v1239_v11 }
  0x44   :  { %677 = vmatpush.bf16.msrb.mxu2 %v1247_v14 }
  0x45   :  { %690 = vmatpush.bf16.msrb.mxu3 %v1255_v15  ;;  %652 = vmatmul.bf16.vlgmr.msrb.gmra.mxu0 %v196_v16 }
  0x46   :  { %665 = vmatmul.bf16.vlgmr.msrb.gmra.mxu1 %v197_v17  ;;  %777 = vmatpush.bf16.msra.mxu0 %v1270_v20 }
  0x47   :  { %678 = vmatmul.bf16.vlgmr.msrb.gmra.mxu2 %v198_v18  ;;  %860 = vmatpush.bf16.msra.mxu1 %v1278_v36 }
  0x48   :  { %691 = vmatmul.bf16.vlgmr.msrb.gmra.mxu3 %v199_v19 }
  0x4a   :  { %778 = vmatpush.bf16.msra.mxu0 %v1269_v21 }
  0x4b   :  { %861 = vmatpush.bf16.msra.mxu1 %v1277_v37 }
  0x4e   :  { %779 = vmatpush.bf16.msra.mxu0 %v1268_v22 }
  0x4f   :  { %862 = vmatpush.bf16.msra.mxu1 %v1276_v39 }
  0x52   :  { %780 = vmatpush.bf16.msra.mxu0 %v1267_v23 }
  0x53   :  { %863 = vmatpush.bf16.msra.mxu1 %v1275_v41 }
  0x56   :  { %781 = vmatpush.bf16.msra.mxu0 %v1266_v24 }
  0x57   :  { %864 = vmatpush.bf16.msra.mxu1 %v1274_v45 }
  0x5a   :  { %782 = vmatpush.bf16.msra.mxu0 %v1265_v27 }
  0x5b   :  { %865 = vmatpush.bf16.msra.mxu1 %v1273_v47 }
  0x5e   :  { %783 = vmatpush.bf16.msra.mxu0 %v1264_v29 }
  0x5f   :  { %866 = vmatpush.bf16.msra.mxu1 %v1272_v61 }
  0x62   :  { %784 = vmatpush.bf16.msra.mxu0 %v1263_v33 }
  0x63   :  { %867 = vmatpush.bf16.msra.mxu1 %v1271_v62 }
  0xa2   :  { %v601_v25 = vpop.f32.mrf.mxu0 }
  0xa3   :  { %v614_v26 = vpop.f32.mrf.mxu1 }
  0xa4   :  { %v615_v38 = vadd.f32 %v614_v26, %v601_v25 }
  0xaa   :  { %v627_v28 = vpop.f32.mrf.mxu2  ;;  %v603_v31 = vpop.f32.mrf.mxu0 }
  0xab   :  { %v640_v30 = vpop.f32.mrf.mxu3  ;;  %v616_v32 = vpop.f32.mrf.mxu1  ;;  %v628_v40 = vadd.f32 %v627_v28, %v615_v38 }
  0xad   :  { %v641_v42 = vadd.f32 %v640_v30, %v628_v40 }
  0xb2   :  { %v629_v34 = vpop.f32.mrf.mxu2 }
  0xb3   :  { %v642_v35 = vpop.f32.mrf.mxu3 }
  0xc2   :  { %v653_v43 = vpop.f32.mrf.mxu0 }
  0xc3   :  { %v666_v44 = vpop.f32.mrf.mxu1  ;;  %v654_v46 = vadd.f32 %v653_v43, %v641_v42 }
  0xc5   :  { %v667_v48 = vadd.f32 %v666_v44, %v654_v46 }
  0xca   :  { %v679_v49 = vpop.f32.mrf.mxu2  ;;  %v655_v53 = vpop.f32.mrf.mxu0 }
  0xcb   :  { %v692_v50 = vpop.f32.mrf.mxu3  ;;  %v680_v51 = vadd.f32 %v679_v49, %v667_v48  ;;  %v668_v54 = vpop.f32.mrf.mxu1 }
  0xcd   :  { %v693_v55 = vadd.f32 %v692_v50, %v680_v51 }
  0xcf   :  { %v706_v56 = vadd.f32 %v1282_v52, %v693_v55 }
  0xd1   :  { %v707_v57 = vmax.f32 %v706_v56, 0.0 }
  0xd2   :  { %v681_v58 = vpop.f32.mrf.mxu2 }
  0xd3   :  { %v694_v59 = vpop.f32.mrf.mxu3  ;;  %v708_v60 = vpack.c.bf16 %v707_v57, %v707_v57 }
  0xd5   :  { %785 = vmatmul.bf16.vlgmr.msra.gmra.mxu0 %v708_v60 }
 0x152   :  { %v786_v0 = vpop.f32.mrf.mxu0 }
 0x153   :  { %v787_v1 = vadd.f32 %v1283_v63, %v786_v0 }
 0x155   :  { %v790_v2 = vmax.f32 %v787_v1, 0.0 }
 0x157   :  { %v791_v3 = vpack.c.bf16 %v790_v2, %v790_v2 }
 0x159   :  { %868 = vmatmul.bf16.vlgmr.msra.gmra.mxu1 %v791_v3 }
 0x15a   :  { %v788_v4 = vpop.f32.mrf.mxu0 }
 0x1d6   :  { %v869_v6 = vpop.f32.mrf.mxu1 }
 0x1d7   :  { %v870_v7 = vadd.f32 %v1284_v5, %v869_v6 }
 0x1d9   :  { %873 = vst [vmem:[%s1436_s7] sm:$0xff] %v870_v7 }
 0x1de   :  { %v871_v8 = vpop.f32.mrf.mxu1 }
 0x1df   :  { %878 = vsyncpa [#allocation4], 1 }

</bundles_post_ra>
